<compile_context>
chip_gen: v6e
topology: v6e:2x2x1
jax: 0.10.0
libtpu: 0.0.40
codegen_flags: <defaults>
</compile_context>

<pallas_src>
import jax
import jax.numpy as jnp
from jax.experimental import pallas as pl
from jax.experimental.pallas import tpu as pltpu


def mlp_kernel(xt_ref, w1_ref, b1_ref, w2_ref, b2_ref, ot_ref):
    # xt: (F, N)  w1: (H, F)  b1: (H, 1)  w2: (O, H)  b2: (O, 1)  ot: (O, N)
    # First layer: (H, F) @ (F, N) -> (H, N); bias broadcasts along lanes.
    h = jnp.dot(w1_ref[...], xt_ref[...], preferred_element_type=jnp.float32)
    h = jnp.maximum(h + b1_ref[...], 0.0)          # ReLU, f32 accumulator kept
    # Second layer: (O, H) @ (H, N) -> (O, N). Keep h in f32 (no downcast of
    # the first-layer accumulator before the second matmul).
    o = jnp.dot(w2_ref[...], h, preferred_element_type=jnp.float32)
    ot_ref[...] = (o + b2_ref[...]).astype(ot_ref.dtype)


def net_forward(x, w1, b1, w2, b2):
    """Pallas implementation of: predict(relu(hidden(x))).

    x : (N, F)   w1 : (H, F)   b1 : (H,)   w2 : (O, H)   b2 : (O,)
    (weights in PyTorch nn.Linear orientation: (out_features, in_features))
    Returns (N, O).
    """
    n, f = x.shape
    h = w1.shape[0]
    o = w2.shape[0]

    xt = x.T                      # (F, N): batch on the lane axis
    b1_2d = b1.reshape(h, 1)      # broadcast along lanes inside the kernel
    b2_2d = b2.reshape(o, 1)

    vmem = pl.BlockSpec(memory_space=pltpu.MemorySpace.VMEM)

    out_t = pl.pallas_call(
        mlp_kernel,
        out_shape=jax.ShapeDtypeStruct((o, n), x.dtype),
        in_specs=[vmem, vmem, vmem, vmem, vmem],   # full arrays, single step
        out_specs=vmem,
    )(xt, w1, b1_2d, w2, b2_2d)

    return out_t.T                # (N, O), matches PyTorch output layout


def reference_forward(x, w1, b1, w2, b2):
    h = jnp.maximum(x @ w1.T + b1, 0.0)
    return h @ w2.T + b2


if __name__ == "__main__":
    key = jax.random.PRNGKey(0)
    k_x0, k_x1, k_w1, k_b1, k_w2, k_b2 = jax.random.split(key, 6)

    # Mirror the PyTorch data construction:
    #   x0 ~ N(+2, 1) of shape (100, 2), x1 ~ N(-2, 1), concatenated -> (200, 2)
    n_features, n_hidden, n_output = 2, 32, 2
    x0 = 2.0 + jax.random.normal(k_x0, (100, n_features), dtype=jnp.float32)
    x1 = -2.0 + jax.random.normal(k_x1, (100, n_features), dtype=jnp.float32)
    x = jnp.concatenate([x0, x1], axis=0)

    # Deterministic parameter init (uniform, PyTorch Linear default bounds),
    # in PyTorch-native (out_features, in_features) orientation.
    lim1 = 1.0 / jnp.sqrt(n_features)
    lim2 = 1.0 / jnp.sqrt(n_hidden)
    w1 = jax.random.uniform(k_w1, (n_hidden, n_features), jnp.float32, -lim1, lim1)
    b1 = jax.random.uniform(k_b1, (n_hidden,), jnp.float32, -lim1, lim1)
    w2 = jax.random.uniform(k_w2, (n_output, n_hidden), jnp.float32, -lim2, lim2)
    b2 = jax.random.uniform(k_b2, (n_output,), jnp.float32, -lim2, lim2)

    fwd = jax.jit(net_forward)
    out = fwd(x, w1, b1, w2, b2)
    out = jax.block_until_ready(out)

    ref = reference_forward(x, w1, b1, w2, b2)
    assert out.shape == (200, n_output), out.shape
    assert jnp.allclose(out, ref, atol=1e-5, rtol=1e-5), "mismatch vs reference"

    print("KERNEL_OK")
</pallas_src>

<mosaic_0001>
module attributes {stable_mosaic.version = 11 : i64} {
  func.func @mlp_kernel(%arg0: memref<2x200xf32, #tpu.memory_space<vmem>>, %arg1: memref<32x2xf32, #tpu.memory_space<vmem>>, %arg2: memref<32x1xf32, #tpu.memory_space<vmem>>, %arg3: memref<2x32xf32, #tpu.memory_space<vmem>>, %arg4: memref<2x1xf32, #tpu.memory_space<vmem>>, %arg5: memref<2x200xf32, #tpu.memory_space<vmem>>) attributes {dimension_semantics = [], scalar_prefetch = 0 : i64, scratch_operands = 0 : i64, tpu.core_type = #tpu.core_type<tc>} {
    %c0 = arith.constant 0 : index
    %c0_0 = arith.constant 0 : index
    %0 = vector.load %arg1[%c0, %c0_0] : memref<32x2xf32, #tpu.memory_space<vmem>>, vector<32x2xf32>
    %c0_1 = arith.constant 0 : index
    %c0_2 = arith.constant 0 : index
    %1 = vector.load %arg0[%c0_1, %c0_2] : memref<2x200xf32, #tpu.memory_space<vmem>>, vector<2x200xf32>
    %cst = arith.constant dense<0.000000e+00> : vector<32x200xf32>
    %2 = tpu.matmul %0, %1, %cst {dimension_numbers = #tpu.dot_dimension_numbers<[1], [0], [0], [1], [0, 0, 1, 1], [], []>} : vector<32x2xf32>, vector<2x200xf32>, vector<32x200xf32> -> vector<32x200xf32>
    %c0_3 = arith.constant 0 : index
    %c0_4 = arith.constant 0 : index
    %3 = vector.load %arg2[%c0_3, %c0_4] : memref<32x1xf32, #tpu.memory_space<vmem>>, vector<32x1xf32>
    %4 = vector.broadcast %3 : vector<32x1xf32> to vector<32x200xf32>
    %5 = arith.addf %2, %4 : vector<32x200xf32>
    %cst_5 = arith.constant 0.000000e+00 : f32
    %6 = vector.broadcast %cst_5 : f32 to vector<32x200xf32>
    %7 = arith.maximumf %5, %6 : vector<32x200xf32>
    %c0_6 = arith.constant 0 : index
    %c0_7 = arith.constant 0 : index
    %8 = vector.load %arg3[%c0_6, %c0_7] : memref<2x32xf32, #tpu.memory_space<vmem>>, vector<2x32xf32>
    %cst_8 = arith.constant dense<0.000000e+00> : vector<2x200xf32>
    %9 = tpu.matmul %8, %7, %cst_8 {dimension_numbers = #tpu.dot_dimension_numbers<[1], [0], [0], [1], [0, 0, 1, 1], [], []>} : vector<2x32xf32>, vector<32x200xf32>, vector<2x200xf32> -> vector<2x200xf32>
    %c0_9 = arith.constant 0 : index
    %c0_10 = arith.constant 0 : index
    %10 = vector.load %arg4[%c0_9, %c0_10] : memref<2x1xf32, #tpu.memory_space<vmem>>, vector<2x1xf32>
    %11 = vector.broadcast %10 : vector<2x1xf32> to vector<2x200xf32>
    %12 = arith.addf %9, %11 : vector<2x200xf32>
    %c0_11 = arith.constant 0 : index
    %c0_12 = arith.constant 0 : index
    %13 = vector.load %arg5[%c0_11, %c0_12] : memref<2x200xf32, #tpu.memory_space<vmem>>, vector<2x200xf32>
    tpu.vector_store %arg5[%c0_11, %c0_12], %12 {strides = array<i32>} : memref<2x200xf32, #tpu.memory_space<vmem>>, vector<2x200xf32>,
    return
  }
}

</mosaic_0001>

<bundles_post_ra>
// kernel: net_forward.1
= control target key start
LH: loop header
LB: loop body
LE: loop exit
PB: predicated region body
PF: predicated region fallthrough
CT: control target
= control target key end

     0   :  { %vm72_vm0 = vcmask 1041408   ;;  %v320_v2 = vmov 0.0   ;;  %vm59_vm1 = vcmask 15360   ;;  %v321_v4 = vmov 0   ;;  %s397_s0 = inlined_call_operand.vmem [shape: f32[2,200], index: 0, kind: input, shape index: {}]   ;;  %s398_s1 = inlined_call_operand.vmem [shape: f32[32,2], index: 1, kind: input, shape index: {}]   ;;  %s399_s2 = inlined_call_operand.vmem [shape: f32[32,1], index: 2, kind: input, shape index: {}]   ;;  %s400_s3 = inlined_call_operand.vmem [shape: f32[2,32], index: 3, kind: input, shape index: {}]   ;;  %s401_s4 = inlined_call_operand.vmem [shape: f32[2,1], index: 4, kind: input, shape index: {}]   ;;  %s402_s5 = inlined_call_operand.hbm [shape: f32[2,200], index: 5, kind: output, shape index: {}]  }
   0x1   :  { %v284_v0 = vld.sshfl [vmem:[%s397_s0] sm:$0x33 pattern:$0x76325410]  ;;  %141 = vmatprep.mubr.f32.mxu0 %v320_v2  ;;  %249 = vmatprep.mubr.f32.mxu1 %v320_v2  ;;  %v27_v5 = vld [vmem:[%s399_s2 + $0x8] sm:$0xff]  ;;  %v29_v6 = vld [vmem:[%s399_s2 + $0x18] sm:$0xff] }
   0x2   :  { %v58_v1 = vcombine.high %v284_v0, %v284_v0  ;;  %v21_v3 = vld [vmem:[%s398_s1] sm:$0xff]  ;;  %297 = vset.pattern.permute.xlu1 %v321_v4  ;;  %296 = vset.pattern.permute.xlu0 %v321_v4 }
   0x3   :  { %37 = vperm.xlu1 %297, %v27_v5   ;;  %v26_v7 = vld [vmem:[%s399_s2] sm:$0xff]  ;;  %47 = vperm.xlu0 %296, %v29_v6  }
   0x4   :  { %285 = vmatprep.subr.msk.mxu0 %vm72_vm0, %v58_v1 }
   0x5   :  { %286 = vmatpush1.msk.msra.mxu0 %vm72_vm0, %v284_v0 }
   0x6   :  { %10 = vsyncpa [#allocation3], 0  ;;  %287 = vmatmul.mubr.msk.f32.vlgmr.msra.gmra.mxu0 %vm59_vm1, %v21_v3  ;;  %v28_v8 = vld [vmem:[%s399_s2 + $0x10] sm:$0xff]  ;;  %v22_v9 = vld [vmem:[%s398_s1 + $0x8] sm:$0xff]  ;;  %vm181_vm2 = vcmask 261120   ;;  %v262_v44 = vlaneseq  ;;  %vm267_vm3 = vcmask 584706  }
   0x7   :  { %147 = vmatprep.mubr.f32.mxu0 %v320_v2  ;;  %32 = vperm.xlu1 %297, %v26_v7   ;;  %v175_v10 = vld [vmem:[%s401_s4] sm:$0x3]  ;;  %v23_v11 = vld [vmem:[%s398_s1 + $0x10] sm:$0xff]  ;;  %v24_v12 = vld [vmem:[%s398_s1 + $0x18] sm:$0xff]  ;;  %v322_v42 = vmov 1983009808  }
   0x8   :  { %42 = vperm.xlu0 %296, %v28_v8   ;;  %v174_v41 = vld [vmem:[%s400_s3] sm:$0x3]  ;;  %v260_v43 = vunpack.c.l.s4 %v322_v42  ;;  %v263_v46 = vshrl.u32 %v262_v44, 7  ;;  %s323_s11 = smov [#allocation2]   ;;  %vm268_vm4 = vmor %vm267_vm3, %vm72_vm0 }
   0x9   :  { %s276_s12 = sshll.u32 %s323_s11, 4  ;;  %s277_s12 = int_to_ptr.vmem [resolvable:$true] %s276_s12 }
   0xa   :  { %288 = vmatmul.mubr.msk.f32.gmra.mxu0 %vm59_vm1, %v22_v9  ;;  %v261_v45 = vunpack.c.0.s8 %v260_v43  ;;  %s298_s3 = scalar_lea.vmem %s277_s12, 64  ;;  %p303_p1 = scmp.lt.s32.totalorder %s277_s12, %s277_s12 }
   0xb   :  { %153 = vmatprep.mubr.f32.mxu0 %v320_v2  ;;  %p299_p0 = scmp.ne.s32.totalorder %s277_s12, %s298_s3  ;;  %p304_p2 = scmp.lt.s32.totalorder %s298_s3, %s298_s3 }
   0xc   :  { %178 = vperm.xlu0 %296, %v175_v10   ;;  %v264_v52 = vsub.s32 %v261_v45, %v263_v46 }
   0xd   :  { %p305_p3 = por %p304_p2, %p303_p1 }
   0xe   :  { %289 = vmatmul.mubr.msk.f32.gmra.mxu0 %vm59_vm1, %v23_v11 }
   0xf   :  { %159 = vmatprep.mubr.f32.mxu0 %v320_v2  ;;  %p306_p4 = pnand %p305_p3, %p299_p0 }
  0x12   :  { %290 = vmatmul.mubr.msk.f32.gmra.mxu0 %vm59_vm1, %v24_v12 }
  0x7e   :  { %v48_v17 = vpop.permute.xlu0 %47  ;;  %v38_v20 = vpop.permute.xlu1 %37 }
  0x82   :  { %v33_v28 = vpop.permute.xlu1 %32 }
  0x83   :  { %v43_v22 = vpop.permute.xlu0 %42 }
  0x87   :  { %v179_v48 = vpop.permute.xlu0 %178 }
  0xc6   :  { %v143_v13 = vpop.f32.mrf.mxu0 }
  0xc7   :  { %v144_v35 = vadd.f32 %v143_v13, %v33_v28 }
  0xc8   :  { %v145_v14 = vpop.f32.mrf.mxu0 }
  0xc9   :  { %v146_v33 = vadd.f32 %v145_v14, %v33_v28  ;;  %v166_v40 = vmax.f32 %v144_v35, 0.0 }
  0xca   :  { %v149_v15 = vpop.f32.mrf.mxu0 }
  0xcb   :  { %v150_v31 = vadd.f32 %v149_v15, %v38_v20  ;;  %v167_v39 = vmax.f32 %v146_v33, 0.0 }
  0xcc   :  { %v151_v16 = vpop.f32.mrf.mxu0 }
  0xcd   :  { %v152_v29 = vadd.f32 %v151_v16, %v38_v20  ;;  %v168_v38 = vmax.f32 %v150_v31, 0.0 }
  0xce   :  { %v155_v18 = vpop.f32.mrf.mxu0 }
  0xcf   :  { %v156_v27 = vadd.f32 %v155_v18, %v43_v22  ;;  %v169_v37 = vmax.f32 %v152_v29, 0.0 }
  0xd0   :  { %v157_v19 = vpop.f32.mrf.mxu0 }
  0xd1   :  { %v158_v25 = vadd.f32 %v157_v19, %v43_v22  ;;  %v170_v36 = vmax.f32 %v156_v27, 0.0 }
  0xd2   :  { %v161_v21 = vpop.f32.mrf.mxu0 }
  0xd3   :  { %v162_v23 = vadd.f32 %v161_v21, %v48_v17  ;;  %v171_v34 = vmax.f32 %v158_v25, 0.0 }
  0xd4   :  { %v163_v24 = vpop.f32.mrf.mxu0 }
  0xd5   :  { %v164_v26 = vadd.f32 %v163_v24, %v48_v17  ;;  %v172_v32 = vmax.f32 %v162_v23, 0.0 }
  0xd7   :  { %v173_v30 = vmax.f32 %v164_v26, 0.0 }
  0xd9   :  { %209 = vmatprep.subr.mxu1 %v173_v30 }
  0xda   :  { %210 = vmatpush1.msra.mxu1 %v172_v32 }
  0xdb   :  { %211 = vmatprep.subr.mxu1 %v171_v34 }
  0xdc   :  { %212 = vmatpush1.msra.mxu1 %v170_v36 }
  0xdd   :  { %213 = vmatprep.subr.mxu1 %v169_v37 }
  0xde   :  { %214 = vmatpush1.msra.mxu1 %v168_v38 }
  0xdf   :  { %215 = vmatprep.subr.mxu1 %v167_v39 }
  0xe0   :  { %216 = vmatpush1.msra.mxu1 %v166_v40 }
  0xe1   :  { %291 = vmatmul.mubr.msk.f32.vlgmr.msra.gmra.mxu1 %vm181_vm2, %v174_v41 }
 0x1a1   :  { %v251_v47 = vpop.f32.mrf.mxu1 }
 0x1a2   :  { %v252_v50 = vadd.f32 %v251_v47, %v179_v48 }
 0x1a3   :  { %v253_v49 = vpop.f32.mrf.mxu1 }
 0x1a4   :  { %v254_v51 = vadd.f32 %v253_v49, %v179_v48 }
 0x1a6   :  { %v258_v53 = vcombine.low %v252_v50, %v254_v51 }
 0x1a8   :  { %v265_v54 = vrot.slane %v258_v53, %v264_v52 }
 0x1aa   :  { %269 = vst.msk [vmem:[#allocation2] sm:$0xf] %vm268_vm4, %v265_v54 }
 0x1ab   :  { %309 = shalt.err (!%p306_p4)
}
 0x1ac   :  { %279 = dma.vmem_to_hbm [thread:$0]  %s277_s12, 64, %s402_s5, [#allocation3]  }
 0x1ad   :  { %318 = dma.done.wait [#allocation3], 64  }
 0x1ae   :  { %319 = vsyncadd [#allocation3], 4294967232 }
 0x1af   :  { %283 = vsyncpa [#allocation3], 1 }

</bundles_post_ra>
